<compile_context>
chip_gen: v7x
topology: tpu7x:2x2x1
jax: 0.10.0
libtpu: 0.0.40
codegen_flags: <defaults>
</compile_context>

<pallas_src>
import functools

import jax
import jax.numpy as jnp
from jax import lax
from jax.experimental import pallas as pl
from jax.experimental.pallas import tpu as pltpu


def _keypoint_kernel(f_ref, p_ref, wT_ref, b_ref, out_ref,
                     m_ref, l_ref, acc_ref, *, bb, n_total, tn, needs_mask):
    # f_ref:  (BB, C, TN)  bf16 features, points on lanes
    # p_ref:  (BB, 3, TN)  f32 positions, points on lanes (lane-dense)
    # wT_ref: (K, C)       bf16 pre-transposed Linear weight
    # b_ref:  (K, 1)       f32 Linear bias
    # out_ref:(BB, K, 3)   keypoints for this batch block
    # m_ref/l_ref: (BB, K, 1) running max / running sum; acc_ref: (BB, K, 3)
    n_idx = pl.program_id(1)

    @pl.when(n_idx == 0)
    def _init():
        m_ref[...] = jnp.full(m_ref.shape, -jnp.inf, dtype=jnp.float32)
        l_ref[...] = jnp.zeros(l_ref.shape, dtype=jnp.float32)
        acc_ref[...] = jnp.zeros(acc_ref.shape, dtype=jnp.float32)

    wT = wT_ref[...]                    # (K, C) bf16
    bias = b_ref[...]                   # (K, 1) f32
    K = wT.shape[0]

    if needs_mask:
        # Only the last N tile is partial; mask its padded lanes.
        remaining = n_total - n_idx * tn
        valid_k = lax.broadcasted_iota(jnp.int32, (K, tn), 1) < remaining
        valid_3 = lax.broadcasted_iota(jnp.int32, (3, tn), 1) < remaining

    for i in range(bb):                 # static unroll over the batch block
        # scores (K, TN): MXU matmul (bf16 x bf16 -> f32 accumulate), points on lanes.
        scores = jnp.dot(wT, f_ref[i],
                         preferred_element_type=jnp.float32) + bias
        p_tile = p_ref[i]               # (3, TN) f32
        if needs_mask:
            scores = jnp.where(valid_k, scores, -jnp.inf)
            p_tile = jnp.where(valid_3, p_tile, 0.0)

        # Online softmax over the points (lane) axis, all f32.
        m_prev = m_ref[i]                                              # (K, 1)
        m_new = jnp.maximum(m_prev, jnp.max(scores, axis=-1, keepdims=True))
        alpha = jnp.exp(m_prev - m_new)                                # (K, 1)
        e = jnp.exp(scores - m_new)                                    # (K, TN)
        l_ref[i] = alpha * l_ref[i] + jnp.sum(e, axis=-1, keepdims=True)

        # Partial attn @ p on the VPU/XLU (MXU would waste vex pushes at N=3):
        # for each coordinate d, multiply by the sublane-broadcast p row and
        # reduce across lanes.
        parts = [jnp.sum(e * p_tile[d:d + 1, :], axis=-1, keepdims=True)
                 for d in range(3)]                                    # 3 x (K, 1)
        acc_ref[i] = alpha * acc_ref[i] + jnp.concatenate(parts, axis=-1)
        m_ref[i] = m_new

    @pl.when(n_idx == pl.num_programs(1) - 1)
    def _finalize():
        for i in range(bb):
            # Exact divide: runs once per batch element on a (K, 3) tile.
            out_ref[i] = (acc_ref[i] / l_ref[i]).astype(out_ref.dtype)


def _vmem_budget():
    """Per-generation (f-tile bytes, vmem_limit_bytes).

    v5e / v6e have 128 MiB physical VMEM -> larger tiles amortize per-step
    overhead; v7x (and unknown) keeps the conservative 64-MiB-safe budget."""
    try:
        kind = jax.devices()[0].device_kind.lower()
    except Exception:  # pragma: no cover - defensive
        kind = ""
    if ("v5" in kind) or ("v6" in kind):
        return 8 * 1024 * 1024, 64 * 1024 * 1024
    return 4 * 1024 * 1024, 32 * 1024 * 1024


def _choose_tiling(B, C, N, f_itemsize, f_tile_bytes):
    """Pick (TN, n_tiles, needs_mask, BB)."""
    # Largest lane-aligned N tile within the per-tile byte budget.
    max_tn = max(128, (f_tile_bytes // (C * f_itemsize)) // 128 * 128)
    if N <= max_tn:
        tn, n_tiles, needs_mask = N, 1, False          # whole axis in one tile
    else:
        tn = max_tn                                    # multiple of 128
        n_tiles = pl.cdiv(N, tn)
        needs_mask = (N % tn) != 0                     # mask the ragged tail
    # Batch block: amortize the ~0.35us per-grid-step overhead at small N.
    per_batch_bytes = C * tn * f_itemsize + 3 * tn * 4
    bb = max(1, min(B, 8, f_tile_bytes // max(per_batch_bytes, 1)))
    while B % bb != 0:
        bb -= 1
    return tn, n_tiles, needs_mask, bb


def softmax_keypoint_detection(f, p_3n, w, b):
    """f:    (B, C, N) encoder features (DGCNN-native layout).
    p_3n: (B, 3, N) point positions, lane-dense (produced in this layout
          upstream so no per-call transpose is paid).
    w:    (C, K) Linear weight (y = x @ w + b convention); b: (K,) bias.
    Returns keypoints (B, K, 3) float32."""
    B, C, N = f.shape
    K = w.shape[1]
    assert p_3n.shape == (B, 3, N)

    # bf16 feature stream (dominant HBM traffic); matmul accumulates in f32.
    if f.dtype != jnp.bfloat16:
        f = f.astype(jnp.bfloat16)
    wT = jnp.transpose(w).astype(jnp.bfloat16)          # (K, C)
    b2 = b.reshape(K, 1).astype(jnp.float32)
    p_3n = p_3n.astype(jnp.float32)                     # positions stay f32 (tiny stream)

    f_tile_bytes, vmem_limit = _vmem_budget()
    tn, n_tiles, needs_mask, bb = _choose_tiling(B, C, N, f.dtype.itemsize,
                                                 f_tile_bytes)

    kernel = functools.partial(_keypoint_kernel, bb=bb, n_total=N, tn=tn,
                               needs_mask=needs_mask)

    return pl.pallas_call(
        kernel,
        out_shape=jax.ShapeDtypeStruct((B, K, 3), jnp.float32),
        grid_spec=pltpu.PrefetchScalarGridSpec(
            num_scalar_prefetch=0,
            grid=(B // bb, n_tiles),
            in_specs=[
                pl.BlockSpec((bb, C, tn), lambda bi, ni: (bi, 0, ni)),
                pl.BlockSpec((bb, 3, tn), lambda bi, ni: (bi, 0, ni)),
                pl.BlockSpec((K, C), lambda bi, ni: (0, 0)),
                pl.BlockSpec((K, 1), lambda bi, ni: (0, 0)),
            ],
            out_specs=pl.BlockSpec((bb, K, 3), lambda bi, ni: (bi, 0, 0)),
            scratch_shapes=[
                pltpu.VMEM((bb, K, 1), jnp.float32),    # running max
                pltpu.VMEM((bb, K, 1), jnp.float32),    # running sum
                pltpu.VMEM((bb, K, 3), jnp.float32),    # running attn @ p partial
            ],
        ),
        compiler_params=pltpu.CompilerParams(
            dimension_semantics=("parallel", "arbitrary"),
            vmem_limit_bytes=vmem_limit,
        ),
    )(f, p_3n, wT, b2)


if __name__ == "__main__":
    # Small shapes consistent with the module:
    #   batch B=2, points N=16, encoder embed_dim C=32, num_keypoints K=8.
    B, N, C, K = 2, 16, 32, 8
    key = jax.random.PRNGKey(0)
    k_f, k_p, k_w, k_b = jax.random.split(key, 4)

    # Encoder output features in native (B, C, N) layout; positions produced
    # lane-dense as (B, 3, N) by the upstream pipeline.
    f = jax.random.normal(k_f, (B, C, N), dtype=jnp.float32)
    p_3n = jax.random.normal(k_p, (B, 3, N), dtype=jnp.float32)

    # Deterministic Linear(embed_dim -> num_keypoints) parameters.
    w = jax.random.normal(k_w, (C, K), dtype=jnp.float32) * (1.0 / jnp.sqrt(C))
    b = jax.random.normal(k_b, (K,), dtype=jnp.float32) * 0.01

    keypoints = softmax_keypoint_detection(f, p_3n, w, b)
    keypoints = jax.block_until_ready(keypoints)

    # Reference matches the PyTorch forward; features/weights bf16-rounded to
    # mirror the kernel's bf16 MXU stream (both accumulate in f32).
    f_r = f.astype(jnp.bfloat16).astype(jnp.float32)
    w_r = w.astype(jnp.bfloat16).astype(jnp.float32)
    scores = jnp.einsum("bcn,ck->bnk", f_r, w_r,
                        precision=lax.Precision.HIGHEST) + b       # (B, N, K)
    attn = jax.nn.softmax(scores, axis=1)                          # over points
    ref = jnp.einsum("bnk,bdn->bkd", attn, p_3n,
                     precision=lax.Precision.HIGHEST)              # (B, K, 3)

    assert keypoints.shape == (B, K, 3)
    assert jnp.allclose(keypoints, ref, atol=1e-3, rtol=1e-3), (
        float(jnp.max(jnp.abs(keypoints - ref))))
    print("KERNEL_OK")
</pallas_src>

<mosaic_0001>
module attributes {stable_mosaic.version = 11 : i64} {
  func.func @_keypoint_kernel(%arg0: i32, %arg1: i32, %arg2: memref<2x32x16xbf16, #tpu.memory_space<vmem>>, %arg3: memref<2x3x16xf32, #tpu.memory_space<vmem>>, %arg4: memref<8x32xbf16, #tpu.memory_space<vmem>>, %arg5: memref<8x1xf32, #tpu.memory_space<vmem>>, %arg6: memref<2x8x3xf32, #tpu.memory_space<vmem>>, %arg7: memref<2x8x1xf32, #tpu.memory_space<vmem>>, %arg8: memref<2x8x1xf32, #tpu.memory_space<vmem>>, %arg9: memref<2x8x3xf32, #tpu.memory_space<vmem>>) attributes {dimension_semantics = [#tpu.dimension_semantics<parallel>, #tpu.dimension_semantics<arbitrary>], iteration_bounds = array<i64: 1, 1>, scalar_prefetch = 0 : i64, scratch_operands = 3 : i64, tpu.core_type = #tpu.core_type<tc>, window_params = [{transform_indices = @transform_0, window_bounds = array<i64: 2, 32, 16>}, {transform_indices = @transform_1, window_bounds = array<i64: 2, 3, 16>}, {pipeline_mode = #tpu.pipeline_mode<synchronous>, transform_indices = @transform_2, window_bounds = array<i64: 8, 32>}, {pipeline_mode = #tpu.pipeline_mode<synchronous>, transform_indices = @transform_3, window_bounds = array<i64: 8, 1>}, {transform_indices = @transform_4, window_bounds = array<i64: 2, 8, 3>}]} {
    %c0_i32 = arith.constant 0 : i32
    %0 = arith.cmpi eq, %arg1, %c0_i32 : i32
    %1 = arith.extui %0 : i1 to i32
    %c0_i32_0 = arith.constant 0 : i32
    %2 = arith.cmpi ne, %1, %c0_i32_0 : i32
    scf.if %2 {
      %cst_64 = arith.constant 0xFF800000 : f32
      %114 = vector.broadcast %cst_64 : f32 to vector<2x8x1xf32>
      %c0_65 = arith.constant 0 : index
      %c0_66 = arith.constant 0 : index
      %c0_67 = arith.constant 0 : index
      %115 = vector.load %arg7[%c0_65, %c0_66, %c0_67] : memref<2x8x1xf32, #tpu.memory_space<vmem>>, vector<2x8x1xf32>
      tpu.vector_store %arg7[%c0_65, %c0_66, %c0_67], %114 {strides = array<i32>} : memref<2x8x1xf32, #tpu.memory_space<vmem>>, vector<2x8x1xf32>,
      %cst_68 = arith.constant 0.000000e+00 : f32
      %116 = vector.broadcast %cst_68 : f32 to vector<2x8x1xf32>
      %c0_69 = arith.constant 0 : index
      %c0_70 = arith.constant 0 : index
      %c0_71 = arith.constant 0 : index
      %117 = vector.load %arg8[%c0_69, %c0_70, %c0_71] : memref<2x8x1xf32, #tpu.memory_space<vmem>>, vector<2x8x1xf32>
      tpu.vector_store %arg8[%c0_69, %c0_70, %c0_71], %116 {strides = array<i32>} : memref<2x8x1xf32, #tpu.memory_space<vmem>>, vector<2x8x1xf32>,
      %cst_72 = arith.constant 0.000000e+00 : f32
      %118 = vector.broadcast %cst_72 : f32 to vector<2x8x3xf32>
      %c0_73 = arith.constant 0 : index
      %c0_74 = arith.constant 0 : index
      %c0_75 = arith.constant 0 : index
      %119 = vector.load %arg9[%c0_73, %c0_74, %c0_75] : memref<2x8x3xf32, #tpu.memory_space<vmem>>, vector<2x8x3xf32>
      tpu.vector_store %arg9[%c0_73, %c0_74, %c0_75], %118 {strides = array<i32>} : memref<2x8x3xf32, #tpu.memory_space<vmem>>, vector<2x8x3xf32>,
    } else {
    }
    %c0 = arith.constant 0 : index
    %c0_1 = arith.constant 0 : index
    %3 = vector.load %arg4[%c0, %c0_1] : memref<8x32xbf16, #tpu.memory_space<vmem>>, vector<8x32xbf16>
    %c0_2 = arith.constant 0 : index
    %c0_3 = arith.constant 0 : index
    %4 = vector.load %arg5[%c0_2, %c0_3] : memref<8x1xf32, #tpu.memory_space<vmem>>, vector<8x1xf32>
    %c0_4 = arith.constant 0 : index
    %c0_5 = arith.constant 0 : index
    %c0_6 = arith.constant 0 : index
    %5 = vector.load %arg2[%c0_4, %c0_5, %c0_6] : memref<2x32x16xbf16, #tpu.memory_space<vmem>>, vector<1x32x16xbf16>
    %6 = vector.shape_cast %5 : vector<1x32x16xbf16> to vector<32x16xbf16>
    %cst = arith.constant dense<0.000000e+00> : vector<8x16xf32>
    %7 = tpu.matmul %3, %6, %cst {dimension_numbers = #tpu.dot_dimension_numbers<[1], [0], [0], [1], [0, 0, 1, 1], [], []>} : vector<8x32xbf16>, vector<32x16xbf16>, vector<8x16xf32> -> vector<8x16xf32>
    %8 = vector.broadcast %4 : vector<8x1xf32> to vector<8x16xf32>
    %9 = arith.addf %7, %8 : vector<8x16xf32>
    %c0_7 = arith.constant 0 : index
    %c0_8 = arith.constant 0 : index
    %c0_9 = arith.constant 0 : index
    %10 = vector.load %arg3[%c0_7, %c0_8, %c0_9] : memref<2x3x16xf32, #tpu.memory_space<vmem>>, vector<1x3x16xf32>
    %11 = vector.shape_cast %10 : vector<1x3x16xf32> to vector<3x16xf32>
    %c0_10 = arith.constant 0 : index
    %c0_11 = arith.constant 0 : index
    %c0_12 = arith.constant 0 : index
    %12 = vector.load %arg7[%c0_10, %c0_11, %c0_12] : memref<2x8x1xf32, #tpu.memory_space<vmem>>, vector<1x8x1xf32>
    %13 = vector.shape_cast %12 : vector<1x8x1xf32> to vector<8x1xf32>
    %cst_13 = arith.constant dense<0xFF800000> : vector<8xf32>
    %14 = vector.multi_reduction <maximumf>, %9, %cst_13 [1] : vector<8x16xf32> to vector<8xf32>
    %15 = vector.shape_cast %14 : vector<8xf32> to vector<8x1xf32>
    %16 = arith.maximumf %13, %15 : vector<8x1xf32>
    %17 = arith.subf %13, %16 : vector<8x1xf32>
    %18 = math.exp %17 : vector<8x1xf32>
    %19 = vector.broadcast %16 : vector<8x1xf32> to vector<8x16xf32>
    %20 = arith.subf %9, %19 : vector<8x16xf32>
    %21 = math.exp %20 : vector<8x16xf32>
    %c0_14 = arith.constant 0 : index
    %c0_15 = arith.constant 0 : index
    %c0_16 = arith.constant 0 : index
    %22 = vector.load %arg8[%c0_14, %c0_15, %c0_16] : memref<2x8x1xf32, #tpu.memory_space<vmem>>, vector<1x8x1xf32>
    %23 = vector.shape_cast %22 : vector<1x8x1xf32> to vector<8x1xf32>
    %24 = arith.mulf %18, %23 : vector<8x1xf32>
    %cst_17 = arith.constant dense<0.000000e+00> : vector<8xf32>
    %25 = vector.multi_reduction <add>, %21, %cst_17 [1] : vector<8x16xf32> to vector<8xf32>
    %26 = vector.shape_cast %25 : vector<8xf32> to vector<8x1xf32>
    %27 = arith.addf %24, %26 : vector<8x1xf32>
    %c0_18 = arith.constant 0 : index
    %c0_19 = arith.constant 0 : index
    %c0_20 = arith.constant 0 : index
    %28 = vector.load %arg8[%c0_18, %c0_19, %c0_20] : memref<2x8x1xf32, #tpu.memory_space<vmem>>, vector<1x8x1xf32>
    %29 = vector.shape_cast %28 : vector<1x8x1xf32> to vector<8x1xf32>
    %30 = vector.shape_cast %27 : vector<8x1xf32> to vector<1x8x1xf32>
    tpu.vector_store %arg8[%c0_18, %c0_19, %c0_20], %30 {strides = array<i32>} : memref<2x8x1xf32, #tpu.memory_space<vmem>>, vector<1x8x1xf32>,
    %31 = vector.extract_strided_slice %11 {offsets = [0, 0], sizes = [1, 16], strides = [1, 1]} : vector<3x16xf32> to vector<1x16xf32>
    %32 = vector.broadcast %31 : vector<1x16xf32> to vector<8x16xf32>
    %33 = arith.mulf %21, %32 : vector<8x16xf32>
    %cst_21 = arith.constant dense<0.000000e+00> : vector<8xf32>
    %34 = vector.multi_reduction <add>, %33, %cst_21 [1] : vector<8x16xf32> to vector<8xf32>
    %35 = vector.shape_cast %34 : vector<8xf32> to vector<8x1xf32>
    %36 = vector.extract_strided_slice %11 {offsets = [1, 0], sizes = [1, 16], strides = [1, 1]} : vector<3x16xf32> to vector<1x16xf32>
    %37 = vector.broadcast %36 : vector<1x16xf32> to vector<8x16xf32>
    %38 = arith.mulf %21, %37 : vector<8x16xf32>
    %cst_22 = arith.constant dense<0.000000e+00> : vector<8xf32>
    %39 = vector.multi_reduction <add>, %38, %cst_22 [1] : vector<8x16xf32> to vector<8xf32>
    %40 = vector.shape_cast %39 : vector<8xf32> to vector<8x1xf32>
    %41 = vector.extract_strided_slice %11 {offsets = [2, 0], sizes = [1, 16], strides = [1, 1]} : vector<3x16xf32> to vector<1x16xf32>
    %42 = vector.broadcast %41 : vector<1x16xf32> to vector<8x16xf32>
    %43 = arith.mulf %21, %42 : vector<8x16xf32>
    %cst_23 = arith.constant dense<0.000000e+00> : vector<8xf32>
    %44 = vector.multi_reduction <add>, %43, %cst_23 [1] : vector<8x16xf32> to vector<8xf32>
    %45 = vector.shape_cast %44 : vector<8xf32> to vector<8x1xf32>
    %c0_24 = arith.constant 0 : index
    %c0_25 = arith.constant 0 : index
    %c0_26 = arith.constant 0 : index
    %46 = vector.load %arg9[%c0_24, %c0_25, %c0_26] : memref<2x8x3xf32, #tpu.memory_space<vmem>>, vector<1x8x3xf32>
    %47 = vector.shape_cast %46 : vector<1x8x3xf32> to vector<8x3xf32>
    %48 = vector.broadcast %18 : vector<8x1xf32> to vector<8x3xf32>
    %49 = arith.mulf %48, %47 : vector<8x3xf32>
    %50 = tpu.concatenate %35, %40, %45 in 1 : vector<8x1xf32>, vector<8x1xf32>, vector<8x1xf32> -> vector<8x3xf32>
    %51 = arith.addf %49, %50 : vector<8x3xf32>
    %c0_27 = arith.constant 0 : index
    %c0_28 = arith.constant 0 : index
    %c0_29 = arith.constant 0 : index
    %52 = vector.load %arg9[%c0_27, %c0_28, %c0_29] : memref<2x8x3xf32, #tpu.memory_space<vmem>>, vector<1x8x3xf32>
    %53 = vector.shape_cast %52 : vector<1x8x3xf32> to vector<8x3xf32>
    %54 = vector.shape_cast %51 : vector<8x3xf32> to vector<1x8x3xf32>
    tpu.vector_store %arg9[%c0_27, %c0_28, %c0_29], %54 {strides = array<i32>} : memref<2x8x3xf32, #tpu.memory_space<vmem>>, vector<1x8x3xf32>,
    %c0_30 = arith.constant 0 : index
    %c0_31 = arith.constant 0 : index
    %c0_32 = arith.constant 0 : index
    %55 = vector.load %arg7[%c0_30, %c0_31, %c0_32] : memref<2x8x1xf32, #tpu.memory_space<vmem>>, vector<1x8x1xf32>
    %56 = vector.shape_cast %55 : vector<1x8x1xf32> to vector<8x1xf32>
    %57 = vector.shape_cast %16 : vector<8x1xf32> to vector<1x8x1xf32>
    tpu.vector_store %arg7[%c0_30, %c0_31, %c0_32], %57 {strides = array<i32>} : memref<2x8x1xf32, #tpu.memory_space<vmem>>, vector<1x8x1xf32>,
    %c1 = arith.constant 1 : index
    %c0_33 = arith.constant 0 : index
    %c0_34 = arith.constant 0 : index
    %58 = vector.load %arg2[%c1, %c0_33, %c0_34] : memref<2x32x16xbf16, #tpu.memory_space<vmem>>, vector<1x32x16xbf16>
    %59 = vector.shape_cast %58 : vector<1x32x16xbf16> to vector<32x16xbf16>
    %cst_35 = arith.constant dense<0.000000e+00> : vector<8x16xf32>
    %60 = tpu.matmul %3, %59, %cst_35 {dimension_numbers = #tpu.dot_dimension_numbers<[1], [0], [0], [1], [0, 0, 1, 1], [], []>} : vector<8x32xbf16>, vector<32x16xbf16>, vector<8x16xf32> -> vector<8x16xf32>
    %61 = vector.broadcast %4 : vector<8x1xf32> to vector<8x16xf32>
    %62 = arith.addf %60, %61 : vector<8x16xf32>
    %c1_36 = arith.constant 1 : index
    %c0_37 = arith.constant 0 : index
    %c0_38 = arith.constant 0 : index
    %63 = vector.load %arg3[%c1_36, %c0_37, %c0_38] : memref<2x3x16xf32, #tpu.memory_space<vmem>>, vector<1x3x16xf32>
    %64 = vector.shape_cast %63 : vector<1x3x16xf32> to vector<3x16xf32>
    %c1_39 = arith.constant 1 : index
    %c0_40 = arith.constant 0 : index
    %c0_41 = arith.constant 0 : index
    %65 = vector.load %arg7[%c1_39, %c0_40, %c0_41] : memref<2x8x1xf32, #tpu.memory_space<vmem>>, vector<1x8x1xf32>
    %66 = vector.shape_cast %65 : vector<1x8x1xf32> to vector<8x1xf32>
    %cst_42 = arith.constant dense<0xFF800000> : vector<8xf32>
    %67 = vector.multi_reduction <maximumf>, %62, %cst_42 [1] : vector<8x16xf32> to vector<8xf32>
    %68 = vector.shape_cast %67 : vector<8xf32> to vector<8x1xf32>
    %69 = arith.maximumf %66, %68 : vector<8x1xf32>
    %70 = arith.subf %66, %69 : vector<8x1xf32>
    %71 = math.exp %70 : vector<8x1xf32>
    %72 = vector.broadcast %69 : vector<8x1xf32> to vector<8x16xf32>
    %73 = arith.subf %62, %72 : vector<8x16xf32>
    %74 = math.exp %73 : vector<8x16xf32>
    %c1_43 = arith.constant 1 : index
    %c0_44 = arith.constant 0 : index
    %c0_45 = arith.constant 0 : index
    %75 = vector.load %arg8[%c1_43, %c0_44, %c0_45] : memref<2x8x1xf32, #tpu.memory_space<vmem>>, vector<1x8x1xf32>
    %76 = vector.shape_cast %75 : vector<1x8x1xf32> to vector<8x1xf32>
    %77 = arith.mulf %71, %76 : vector<8x1xf32>
    %cst_46 = arith.constant dense<0.000000e+00> : vector<8xf32>
    %78 = vector.multi_reduction <add>, %74, %cst_46 [1] : vector<8x16xf32> to vector<8xf32>
    %79 = vector.shape_cast %78 : vector<8xf32> to vector<8x1xf32>
    %80 = arith.addf %77, %79 : vector<8x1xf32>
    %c1_47 = arith.constant 1 : index
    %c0_48 = arith.constant 0 : index
    %c0_49 = arith.constant 0 : index
    %81 = vector.load %arg8[%c1_47, %c0_48, %c0_49] : memref<2x8x1xf32, #tpu.memory_space<vmem>>, vector<1x8x1xf32>
    %82 = vector.shape_cast %81 : vector<1x8x1xf32> to vector<8x1xf32>
    %83 = vector.shape_cast %80 : vector<8x1xf32> to vector<1x8x1xf32>
    tpu.vector_store %arg8[%c1_47, %c0_48, %c0_49], %83 {strides = array<i32>} : memref<2x8x1xf32, #tpu.memory_space<vmem>>, vector<1x8x1xf32>,
    %84 = vector.extract_strided_slice %64 {offsets = [0, 0], sizes = [1, 16], strides = [1, 1]} : vector<3x16xf32> to vector<1x16xf32>
    %85 = vector.broadcast %84 : vector<1x16xf32> to vector<8x16xf32>
    %86 = arith.mulf %74, %85 : vector<8x16xf32>
    %cst_50 = arith.constant dense<0.000000e+00> : vector<8xf32>
    %87 = vector.multi_reduction <add>, %86, %cst_50 [1] : vector<8x16xf32> to vector<8xf32>
    %88 = vector.shape_cast %87 : vector<8xf32> to vector<8x1xf32>
    %89 = vector.extract_strided_slice %64 {offsets = [1, 0], sizes = [1, 16], strides = [1, 1]} : vector<3x16xf32> to vector<1x16xf32>
    %90 = vector.broadcast %89 : vector<1x16xf32> to vector<8x16xf32>
    %91 = arith.mulf %74, %90 : vector<8x16xf32>
    %cst_51 = arith.constant dense<0.000000e+00> : vector<8xf32>
    %92 = vector.multi_reduction <add>, %91, %cst_51 [1] : vector<8x16xf32> to vector<8xf32>
    %93 = vector.shape_cast %92 : vector<8xf32> to vector<8x1xf32>
    %94 = vector.extract_strided_slice %64 {offsets = [2, 0], sizes = [1, 16], strides = [1, 1]} : vector<3x16xf32> to vector<1x16xf32>
    %95 = vector.broadcast %94 : vector<1x16xf32> to vector<8x16xf32>
    %96 = arith.mulf %74, %95 : vector<8x16xf32>
    %cst_52 = arith.constant dense<0.000000e+00> : vector<8xf32>
    %97 = vector.multi_reduction <add>, %96, %cst_52 [1] : vector<8x16xf32> to vector<8xf32>
    %98 = vector.shape_cast %97 : vector<8xf32> to vector<8x1xf32>
    %c1_53 = arith.constant 1 : index
    %c0_54 = arith.constant 0 : index
    %c0_55 = arith.constant 0 : index
    %99 = vector.load %arg9[%c1_53, %c0_54, %c0_55] : memref<2x8x3xf32, #tpu.memory_space<vmem>>, vector<1x8x3xf32>
    %100 = vector.shape_cast %99 : vector<1x8x3xf32> to vector<8x3xf32>
    %101 = vector.broadcast %71 : vector<8x1xf32> to vector<8x3xf32>
    %102 = arith.mulf %101, %100 : vector<8x3xf32>
    %103 = tpu.concatenate %88, %93, %98 in 1 : vector<8x1xf32>, vector<8x1xf32>, vector<8x1xf32> -> vector<8x3xf32>
    %104 = arith.addf %102, %103 : vector<8x3xf32>
    %c1_56 = arith.constant 1 : index
    %c0_57 = arith.constant 0 : index
    %c0_58 = arith.constant 0 : index
    %105 = vector.load %arg9[%c1_56, %c0_57, %c0_58] : memref<2x8x3xf32, #tpu.memory_space<vmem>>, vector<1x8x3xf32>
    %106 = vector.shape_cast %105 : vector<1x8x3xf32> to vector<8x3xf32>
    %107 = vector.shape_cast %104 : vector<8x3xf32> to vector<1x8x3xf32>
    tpu.vector_store %arg9[%c1_56, %c0_57, %c0_58], %107 {strides = array<i32>} : memref<2x8x3xf32, #tpu.memory_space<vmem>>, vector<1x8x3xf32>,
    %c1_59 = arith.constant 1 : index
    %c0_60 = arith.constant 0 : index
    %c0_61 = arith.constant 0 : index
    %108 = vector.load %arg7[%c1_59, %c0_60, %c0_61] : memref<2x8x1xf32, #tpu.memory_space<vmem>>, vector<1x8x1xf32>
    %109 = vector.shape_cast %108 : vector<1x8x1xf32> to vector<8x1xf32>
    %110 = vector.shape_cast %69 : vector<8x1xf32> to vector<1x8x1xf32>
    tpu.vector_store %arg7[%c1_59, %c0_60, %c0_61], %110 {strides = array<i32>} : memref<2x8x1xf32, #tpu.memory_space<vmem>>, vector<1x8x1xf32>,
    %c0_i32_62 = arith.constant 0 : i32
    %111 = arith.cmpi eq, %arg1, %c0_i32_62 : i32
    %112 = arith.extui %111 : i1 to i32
    %c0_i32_63 = arith.constant 0 : i32
    %113 = arith.cmpi ne, %112, %c0_i32_63 : i32
    scf.if %113 {
      %c0_64 = arith.constant 0 : index
      %c0_65 = arith.constant 0 : index
      %c0_66 = arith.constant 0 : index
      %114 = vector.load %arg9[%c0_64, %c0_65, %c0_66] : memref<2x8x3xf32, #tpu.memory_space<vmem>>, vector<1x8x3xf32>
      %115 = vector.shape_cast %114 : vector<1x8x3xf32> to vector<8x3xf32>
      %c0_67 = arith.constant 0 : index
      %c0_68 = arith.constant 0 : index
      %c0_69 = arith.constant 0 : index
      %116 = vector.load %arg8[%c0_67, %c0_68, %c0_69] : memref<2x8x1xf32, #tpu.memory_space<vmem>>, vector<1x8x1xf32>
      %117 = vector.shape_cast %116 : vector<1x8x1xf32> to vector<8x1xf32>
      %118 = vector.broadcast %117 : vector<8x1xf32> to vector<8x3xf32>
      %119 = arith.divf %115, %118 : vector<8x3xf32>
      %c0_70 = arith.constant 0 : index
      %c0_71 = arith.constant 0 : index
      %c0_72 = arith.constant 0 : index
      %120 = vector.load %arg6[%c0_70, %c0_71, %c0_72] : memref<2x8x3xf32, #tpu.memory_space<vmem>>, vector<1x8x3xf32>
      %121 = vector.shape_cast %120 : vector<1x8x3xf32> to vector<8x3xf32>
      %122 = vector.shape_cast %119 : vector<8x3xf32> to vector<1x8x3xf32>
      tpu.vector_store %arg6[%c0_70, %c0_71, %c0_72], %122 {strides = array<i32>} : memref<2x8x3xf32, #tpu.memory_space<vmem>>, vector<1x8x3xf32>,
      %c1_73 = arith.constant 1 : index
      %c0_74 = arith.constant 0 : index
      %c0_75 = arith.constant 0 : index
      %123 = vector.load %arg9[%c1_73, %c0_74, %c0_75] : memref<2x8x3xf32, #tpu.memory_space<vmem>>, vector<1x8x3xf32>
      %124 = vector.shape_cast %123 : vector<1x8x3xf32> to vector<8x3xf32>
      %c1_76 = arith.constant 1 : index
      %c0_77 = arith.constant 0 : index
      %c0_78 = arith.constant 0 : index
      %125 = vector.load %arg8[%c1_76, %c0_77, %c0_78] : memref<2x8x1xf32, #tpu.memory_space<vmem>>, vector<1x8x1xf32>
      %126 = vector.shape_cast %125 : vector<1x8x1xf32> to vector<8x1xf32>
      %127 = vector.broadcast %126 : vector<8x1xf32> to vector<8x3xf32>
      %128 = arith.divf %124, %127 : vector<8x3xf32>
      %c1_79 = arith.constant 1 : index
      %c0_80 = arith.constant 0 : index
      %c0_81 = arith.constant 0 : index
      %129 = vector.load %arg6[%c1_79, %c0_80, %c0_81] : memref<2x8x3xf32, #tpu.memory_space<vmem>>, vector<1x8x3xf32>
      %130 = vector.shape_cast %129 : vector<1x8x3xf32> to vector<8x3xf32>
      %131 = vector.shape_cast %128 : vector<8x3xf32> to vector<1x8x3xf32>
      tpu.vector_store %arg6[%c1_79, %c0_80, %c0_81], %131 {strides = array<i32>} : memref<2x8x3xf32, #tpu.memory_space<vmem>>, vector<1x8x3xf32>,
    } else {
    }
    return
  }
  func.func @transform_0(%arg0: i32, %arg1: i32) -> (i32, i32, i32) {
    %c0_i32 = arith.constant 0 : i32
    %c0_i32_0 = arith.constant 0 : i32
    return %arg0, %c0_i32, %arg1 : i32, i32, i32
  }
  func.func @transform_1(%arg0: i32, %arg1: i32) -> (i32, i32, i32) {
    %c0_i32 = arith.constant 0 : i32
    %c0_i32_0 = arith.constant 0 : i32
    return %arg0, %c0_i32, %arg1 : i32, i32, i32
  }
  func.func @transform_2(%arg0: i32, %arg1: i32) -> (i32, i32) {
    %c0_i32 = arith.constant 0 : i32
    %c0_i32_0 = arith.constant 0 : i32
    %c0_i32_1 = arith.constant 0 : i32
    return %c0_i32, %c0_i32_0 : i32, i32
  }
  func.func @transform_3(%arg0: i32, %arg1: i32) -> (i32, i32) {
    %c0_i32 = arith.constant 0 : i32
    %c0_i32_0 = arith.constant 0 : i32
    %c0_i32_1 = arith.constant 0 : i32
    return %c0_i32, %c0_i32_0 : i32, i32
  }
  func.func @transform_4(%arg0: i32, %arg1: i32) -> (i32, i32, i32) {
    %c0_i32 = arith.constant 0 : i32
    %c0_i32_0 = arith.constant 0 : i32
    %c0_i32_1 = arith.constant 0 : i32
    return %arg0, %c0_i32, %c0_i32_0 : i32, i32, i32
  }
}

</mosaic_0001>

<bundles_post_ra>
// kernel: tpu_custom_call.1
= control target key start
LH: loop header
LB: loop body
LE: loop exit
PB: predicated region body
PF: predicated region fallthrough
CT: control target
= control target key end

     0   :  { %v366_v0 = vmov 0.0   ;;  %vm367_vm0 = vmmov 0   ;;  %v368_v4 = vmov 0   ;;  %vm53_vm1 = vcmask 261120   ;;  %s461_s0 = inlined_call_operand.vmem [shape: bf16[2,32,16], index: 0, kind: input, shape index: {}]   ;;  %s462_s3 = inlined_call_operand.vmem [shape: f32[8,1], index: 3, kind: input, shape index: {}]   ;;  %s463_s2 = inlined_call_operand.vmem [shape: bf16[8,32], index: 2, kind: input, shape index: {}]   ;;  %s464_s1 = inlined_call_operand.vmem [shape: f32[2,3,16], index: 1, kind: input, shape index: {}]   ;;  %s465_s4 = inlined_call_operand.vmem [shape: f32[2,8,3], index: 4, kind: output, shape index: {}]  }
   0x1   :  { %328 = vmatprep.subr.bf16.mxu0 %v366_v0  ;;  %336 = vmatprep.subr.bf16.mxu1 %v366_v0  ;;  %v350_v1 = vld [vmem:[%s461_s0] sm:$0xff]   ;;  %v351_v2 = vld [vmem:[%s461_s0 + $0x10] sm:$0xff]   ;;  %v352_v3 = vld [vmem:[%s461_s0 + $0x8] sm:$0xff]   ;;  %vm22_vm2 = vcmask 7168   ;;  %v369_v8 = vmov -inf   ;;  %vm99_vm3 = vcmask 130048   ;;  %v123_v37 = vlaneseq }
   0x2   :  { %332 = vmatprep.mubr.msk.bf16.mxu0 %vm367_vm0, %v366_v0  ;;  %340 = vmatprep.mubr.msk.bf16.mxu1 %vm367_vm0, %v366_v0  ;;  %v353_v5 = vld [vmem:[%s461_s0 + $0x18] sm:$0xff]   ;;  %v31_v6 = vld [vmem:[%s462_s3] sm:$0xff]  ;;  %24 = vst.msk [vmem:[#allocation2 + $0x8] sm:$0xff] %vm22_vm2, %v369_v8  ;;  %23 = vst.msk [vmem:[#allocation2] sm:$0xff] %vm22_vm2, %v369_v8  ;;  %vm27_vm4 = vcmask 23552   ;;  %vm155_vm5 = vcmask 15360  }
   0x3   :  { %329 = vmatpush3.bf16.msra.mxu0 %v350_v1  ;;  %348 = vset.pattern.permute.xlu0 %v368_v4  ;;  %v30_v7 = vld [vmem:[%s463_s2] sm:$0xf]  ;;  %25 = vst.msk [vmem:[#allocation3] sm:$0xff] %vm22_vm2, %v366_v0  ;;  %26 = vst.msk [vmem:[#allocation3 + $0x8] sm:$0xff] %vm22_vm2, %v366_v0  ;;  %v124_v39 = vshrl.u32 %v123_v37, 7 }
   0x4   :  { %337 = vmatpush3.bf16.msra.mxu1 %v351_v2  ;;  %330 = vmatprep.subr.bf16.mxu0 %v366_v0  ;;  %28 = vst.msk [vmem:[#allocation4] sm:$0xff] %vm27_vm4, %v366_v0  ;;  %29 = vst.msk [vmem:[#allocation4 + $0x8] sm:$0xff] %vm27_vm4, %v366_v0  ;;  %v320_v40 = vld [vmem:[%s464_s1 + $0x4] sm:$0x7]  ;;  %v97_v59 = vld [vmem:[%s464_s1] sm:$0x7] }
   0x5   :  { %338 = vmatprep.subr.bf16.mxu1 %v366_v0  ;;  %349 = vset.pattern.permute.xlu1 %v368_v4  ;;  %v125_v41 = vsub.s32 0, %v124_v39  ;;  %v133_v45 = vsub.s32 1, %v124_v39  ;;  %v141_v50 = vsub.s32 2, %v124_v39 }
   0x6   :  { %38 = vperm.xlu0 %348, %v31_v6  }
   0x7   :  { %331 = vmatpush3.bf16.msra.mxu0 %v352_v3  ;;  %v248_v44 = vrot.slane %v320_v40, %v125_v41  ;;  %v256_v46 = vrot.slane %v320_v40, %v133_v45  ;;  %v264_v53 = vrot.slane %v320_v40, %v141_v50  ;;  %v126_v60 = vrot.slane %v97_v59, %v125_v41 }
   0x8   :  { %339 = vmatpush3.bf16.msra.mxu1 %v353_v5  ;;  %v134_v62 = vrot.slane %v97_v59, %v133_v45  ;;  %v142_v1 = vrot.slane %v97_v59, %v141_v50 }
   0x9   :  { %v98_v22 = vld [vmem:[#allocation2] sm:$0xff]  ;;  %v221_v23 = vld [vmem:[#allocation2 + $0x8] sm:$0xff] }
   0xa   :  { %333 = vmatmul.mubr.msk.bf16.vlgmr.msra.gmra.mrb[0].mxu0 %vm53_vm1, %v30_v7  ;;  %v115_v5 = vld [vmem:[#allocation3] sm:$0xff] }
   0xb   :  { %341 = vmatmul.mubr.msk.bf16.vlgmr.msra.gmra.mrb[0].mxu1 %vm53_vm1, %v30_v7 }
  0x85   :  { %v39_v9 = vpop.permute.xlu0 %38 }
  0xdd   :  { %v91_v10 = vpop.f32.mrb[0].mxu0 }
  0xde   :  { %v92_v11 = vadd.f32 %v91_v10, %v39_v9  ;;  %v212_v12 = vpop.f32.mrb[0].mxu1  ;;  %v334_v13 = vpop.f32.mrb[1].mxu0 }
  0xdf   :  { %v213_v14 = vadd.f32 %v212_v12, %v39_v9  ;;  %v94_v15 = vpop.f32.mrb[2].mxu0  ;;  %v342_v16 = vpop.f32.mrb[1].mxu1  ;;  %v238_v9 = vld [vmem:[#allocation3 + $0x8] sm:$0xff] }
  0xe0   :  { %v335_v17 = vpop.f32.mrb[3].mxu0  ;;  %v215_v18 = vpop.f32.mrb[2].mxu1  ;;  %v100_v19 = vsel %vm99_vm3, %v92_v11, -inf }
  0xe1   :  { %v222_v20 = vsel %vm99_vm3, %v213_v14, -inf  ;;  %v343_v21 = vpop.f32.mrb[3].mxu1  ;;  %101 = vmax.xlane.f32.xlu0 %v100_v19  ;;  %v270_v17 = vld [vmem:[#allocation4 + $0x8] sm:$0xff] }
  0xe2   :  { %223 = vmax.xlane.f32.xlu1 %v222_v20 }
 0x16e   :  { %v102_v24 = vpop.xlane.xlu0 %101 }
 0x16f   :  { %v224_v25 = vpop.xlane.xlu1 %223  ;;  %v103_v26 = vmax.f32 %v98_v22, %v102_v24 }
 0x170   :  { %v225_v27 = vmax.f32 %v221_v23, %v224_v25 }
 0x171   :  { %v104_v28 = vsub.f32 %v98_v22, %v103_v26  ;;  %160 = vst.msk [vmem:[#allocation2] sm:$0xff] %vm22_vm2, %v103_v26  ;;  %109 = vperm.xlu1 %349, %v103_v26  }
 0x172   :  { %v226_v29 = vsub.f32 %v221_v23, %v225_v27  ;;  %281 = vst.msk [vmem:[#allocation2 + $0x8] sm:$0xff] %vm22_vm2, %v225_v27 }
 0x173   :  { %v105_v30 = vmul.f32 1.442695, %v104_v28 }
 0x174   :  { %v227_v56 = vmul.f32 1.442695, %v226_v29 }
 0x175   :  { %354 = vpow2.f32 %v105_v30  ;;  %231 = vperm.xlu1 %349, %v225_v27   ;;  %v147_v27 = vld [vmem:[#allocation4] sm:$0xff] }
 0x17f   :  { %v355_v31 = vpop.eup %354 }
 0x180   :  { %150 = vperm.xlu0 %348, %v355_v31   ;;  %v116_v6 = vmul.f32 %v355_v31, %v115_v5 }
 0x1f0   :  { %v110_v32 = vpop.permute.xlu1 %109 }
 0x1f1   :  { %v112_v33 = vsub.f32 %v92_v11, %v110_v32 }
 0x1f3   :  { %v113_v34 = vmul.f32 1.442695, %v112_v33 }
 0x1f4   :  { %v232_v35 = vpop.permute.xlu1 %231 }
 0x1f5   :  { %356 = vpow2.f32 %v113_v34  ;;  %v234_v36 = vsub.f32 %v213_v14, %v232_v35 }
 0x1f7   :  { %v235_v38 = vmul.f32 1.442695, %v234_v36 }
 0x1f9   :  { %358 = vpow2.f32 %v235_v38 }
 0x1fa   :  { %360 = vpow2.f32 %v227_v56 }
 0x1ff   :  { %v357_v42 = vpop.eup %356  ;;  %v151_v7 = vpop.permute.xlu0 %150 }
 0x200   :  { %v117_v43 = vsel %vm99_vm3, %v357_v42, 0.0  ;;  %v127_v61 = vmul.f32 %v357_v42, %v126_v60  ;;  %v135_v0 = vmul.f32 %v357_v42, %v134_v62  ;;  %v143_v3 = vmul.f32 %v357_v42, %v142_v1 }
 0x201   :  { %118 = vadd.xlane.f32.xlu1 %v117_v43  ;;  %v153_v28 = vmul.f32 %v151_v7, %v147_v27 }
 0x202   :  { %v128_v63 = vsel %vm99_vm3, %v127_v61, 0.0  ;;  %v136_v2 = vsel %vm99_vm3, %v135_v0, 0.0  ;;  %v144_v4 = vsel %vm99_vm3, %v143_v3, 0.0 }
 0x203   :  { %v359_v47 = vpop.eup %358 }
 0x204   :  { %v240_v48 = vsel %vm99_vm3, %v359_v47, 0.0  ;;  %v249_v49 = vmul.f32 %v359_v47, %v248_v44  ;;  %v257_v52 = vmul.f32 %v359_v47, %v256_v46  ;;  %v265_v55 = vmul.f32 %v359_v47, %v264_v53  ;;  %v361_v58 = vpop.eup %360 }
 0x205   :  { %241 = vadd.xlane.f32.xlu0 %v240_v48  ;;  %v239_v11 = vmul.f32 %v361_v58, %v238_v9 }
 0x206   :  { %v250_v51 = vsel %vm99_vm3, %v249_v49, 0.0  ;;  %v258_v54 = vsel %vm99_vm3, %v257_v52, 0.0  ;;  %v266_v57 = vsel %vm99_vm3, %v265_v55, 0.0 }
 0x207   :  { %251 = vadd.xlane.f32.xlu1 %v250_v51 }
 0x20b   :  { %259 = vadd.xlane.f32.xlu1 %v258_v54 }
 0x20f   :  { %267 = vadd.xlane.f32.xlu1 %v266_v57 }
 0x21b   :  { %273 = vperm.xlu0 %348, %v361_v58  }
 0x23a   :  { %129 = vadd.xlane.f32.xlu0 %v128_v63 }
 0x23e   :  { %137 = vadd.xlane.f32.xlu0 %v136_v2 }
 0x242   :  { %145 = vadd.xlane.f32.xlu0 %v144_v4 }
 0x28e   :  { %v119_v8 = vpop.xlane.xlu1 %118 }
 0x28f   :  { %v120_v10 = vadd.f32 %v119_v8, %v116_v6 }
 0x291   :  { %122 = vst.msk [vmem:[#allocation3] sm:$0xff] %vm22_vm2, %v120_v10 }
 0x292   :  { %v242_v12 = vpop.xlane.xlu0 %241 }
 0x293   :  { %v243_v13 = vadd.f32 %v242_v12, %v239_v11 }
 0x294   :  { %v252_v14 = vpop.xlane.xlu1 %251 }
 0x295   :  { %244 = vst.msk [vmem:[#allocation3 + $0x8] sm:$0xff] %vm22_vm2, %v243_v13 }
 0x298   :  { %v260_v15 = vpop.xlane.xlu1 %259  ;;  %v286_v16 = vld [vmem:[#allocation3] sm:$0xff] }
 0x299   :  { %289 = vperm.xlu1 %349, %v286_v16   ;;  %v277_v20 = vsel %vm22_vm2, %v252_v14, %v260_v15 }
 0x29a   :  { %v274_v18 = vpop.permute.xlu0 %273 }
 0x29b   :  { %v276_v19 = vmul.f32 %v274_v18, %v270_v17 }
 0x29c   :  { %v268_v21 = vpop.xlane.xlu1 %267  ;;  %v296_v22 = vld [vmem:[#allocation3 + $0x8] sm:$0xff] }
 0x29d   :  { %v278_v23 = vsel %vm155_vm5, %v277_v20, %v268_v21  ;;  %299 = vperm.xlu0 %348, %v296_v22  }
 0x29e   :  { %v279_v24 = vadd.f32 %v278_v23, %v276_v19 }
 0x2a0   :  { %280 = vst.msk [vmem:[#allocation4 + $0x8] sm:$0xff] %vm27_vm4, %v279_v24 }
 0x2a7   :  { %v295_v39 = vld [vmem:[#allocation4 + $0x8] sm:$0xff] }
 0x2c7   :  { %v130_v25 = vpop.xlane.xlu0 %129 }
 0x2cb   :  { %v138_v26 = vpop.xlane.xlu0 %137 }
 0x2cc   :  { %v154_v29 = vsel %vm22_vm2, %v130_v25, %v138_v26 }
 0x2cf   :  { %v146_v30 = vpop.xlane.xlu0 %145 }
 0x2d0   :  { %v156_v31 = vsel %vm155_vm5, %v154_v29, %v146_v30 }
 0x2d1   :  { %v157_v32 = vadd.f32 %v156_v31, %v153_v28 }
 0x2d3   :  { %159 = vst.msk [vmem:[#allocation4] sm:$0xff] %vm27_vm4, %v157_v32 }
 0x2da   :  { %v285_v36 = vld [vmem:[#allocation4] sm:$0xff] }
 0x318   :  { %v290_v33 = vpop.permute.xlu1 %289 }
 0x319   :  { %362 = vrcp.f32 %v290_v33 }
 0x31c   :  { %v300_v34 = vpop.permute.xlu0 %299 }
 0x31d   :  { %364 = vrcp.f32 %v300_v34 }
 0x323   :  { %v363_v35 = vpop.eup %362 }
 0x324   :  { %v293_v37 = vmul.f32 %v363_v35, %v285_v36 }
 0x326   :  { %294 = vst.msk [vmem:[%s465_s4] sm:$0xff] %vm27_vm4, %v293_v37 }
 0x327   :  { %v365_v38 = vpop.eup %364 }
 0x328   :  { %v303_v40 = vmul.f32 %v365_v38, %v295_v39 }
 0x32a   :  { %321 = vst.msk [vmem:[%s465_s4 + $0x8] sm:$0xff] %vm27_vm4, %v303_v40 }

</bundles_post_ra>
